<compile_context>
chip_gen: v7x
topology: tpu7x:2x2x1
jax: 0.10.0
libtpu: 0.0.40
codegen_flags: <defaults>
</compile_context>

<pallas_src>
import jax
import jax.numpy as jnp
from jax import lax
from jax.experimental import pallas as pl
from jax.experimental.pallas import tpu as pltpu


LEAKY_SLOPE = 0.2
BN_EPS = 1e-5


def _vmem_limit_bytes():
    """Generation-aware VMEM cap (v5e/v6e: 128 MiB physical, v7x: 64 MiB)."""
    cap = 64 * 1024 * 1024
    try:
        info = pltpu.get_tpu_info()
        cap = int(getattr(info, "vmem_capacity_bytes", cap) or cap)
    except Exception:
        pass
    return int(min((cap * 3) // 4, 100 * 1024 * 1024))


# ----------------------------------------------------------------------------- kernels


def make_upsample_block_kernel(L, C_pad, apply_input_act):
    """Fused [prev BN-affine + LeakyReLU] -> nearest(2x) -> Conv1d(k=3) for one sequence.

    Emits the conv output *pre-BatchNorm* (even / odd output rows separately) plus
    per-channel sum / sum-of-squares accumulated across the batch grid axis.  The BN
    affine is folded in the wrapper and applied inside the *next* block's kernel.
    """

    def kernel(z_ref, a_ref, c_ref, w_ref, b_ref, ze_ref, zo_ref, s_ref, ss_ref):
        n = pl.program_id(0)

        x = z_ref[0]                                        # (L, Cp) f32
        if apply_input_act:
            # previous block's BatchNorm (folded affine) + LeakyReLU(0.2), fused here
            h = x * a_ref[...] + c_ref[...]
            x = jnp.where(h > 0, h, LEAKY_SLOPE * h)

        # (L, 1) within-sequence position; broadcast by jnp.where (no full-width masks)
        l_idx = lax.broadcasted_iota(jnp.int32, (L, 1), 0)
        xm1 = jnp.where(l_idx >= 1, pltpu.roll(x, shift=1, axis=0), 0.0)          # x[m-1]
        xp1 = jnp.where(l_idx <= L - 2, pltpu.roll(x, shift=L - 1, axis=0), 0.0)  # x[m+1]

        # bf16 operands for the MXU, f32 accumulation; elementwise math stays f32
        xb = x.astype(jnp.bfloat16)
        xm1b = xm1.astype(jnp.bfloat16)
        xp1b = xp1.astype(jnp.bfloat16)
        b = b_ref[...]

        # nearest-2x upsample folded into the conv taps: four accumulating matmuls
        z_e = jnp.dot(xm1b, w_ref[0], preferred_element_type=jnp.float32)
        z_e = z_e + jnp.dot(xb, w_ref[1], preferred_element_type=jnp.float32) + b
        z_o = jnp.dot(xb, w_ref[2], preferred_element_type=jnp.float32)
        z_o = z_o + jnp.dot(xp1b, w_ref[3], preferred_element_type=jnp.float32) + b

        ze_ref[0] = z_e
        zo_ref[0] = z_o

        # BatchNorm1d training-mode batch statistics, accumulated across the batch grid
        @pl.when(n == 0)
        def _():
            s_ref[...] = jnp.zeros_like(s_ref)
            ss_ref[...] = jnp.zeros_like(ss_ref)

        s_ref[...] += (jnp.sum(z_e, axis=0, keepdims=True)
                       + jnp.sum(z_o, axis=0, keepdims=True))
        ss_ref[...] += (jnp.sum(z_e * z_e, axis=0, keepdims=True)
                        + jnp.sum(z_o * z_o, axis=0, keepdims=True))

    return kernel


def make_final_conv_kernel(L, C_pad, K):
    """Fused [last block's BN-affine + LeakyReLU] -> final Conv1d(k=K, padding=K//2)."""
    pad = K // 2

    def kernel(z_ref, a_ref, c_ref, w_ref, b_ref, o_ref):
        x = z_ref[0]                                        # (L, Cp) f32
        h = x * a_ref[...] + c_ref[...]
        x = jnp.where(h > 0, h, LEAKY_SLOPE * h)

        l_idx = lax.broadcasted_iota(jnp.int32, (L, 1), 0)
        acc = None
        for k in range(K):
            off = k - pad                                   # tap reads x[l + off]
            if off == 0:
                tap = x
            elif off < 0:
                tap = jnp.where(l_idx >= -off, pltpu.roll(x, shift=-off, axis=0), 0.0)
            else:
                tap = jnp.where(l_idx <= L - 1 - off,
                                pltpu.roll(x, shift=L - off, axis=0), 0.0)
            d = jnp.dot(tap.astype(jnp.bfloat16), w_ref[k],
                        preferred_element_type=jnp.float32)
            acc = d if acc is None else acc + d
        o_ref[0] = acc + b_ref[...]

    return kernel


# ------------------------------------------------------------------------ pallas calls


def _upsample_block_call(z, a, c, w4, b, *, apply_input_act):
    N, L, C_pad = z.shape
    kernel = make_upsample_block_kernel(L, C_pad, apply_input_act)
    row_spec = pl.BlockSpec((1, L, C_pad), lambda n: (n, 0, 0))
    vec_spec = pl.BlockSpec((1, C_pad), lambda n: (0, 0))
    w_spec = pl.BlockSpec((4, C_pad, C_pad), lambda n: (0, 0, 0))
    return pl.pallas_call(
        kernel,
        grid=(N,),
        in_specs=[row_spec, vec_spec, vec_spec, w_spec, vec_spec],
        out_specs=(row_spec, row_spec, vec_spec, vec_spec),
        out_shape=(
            jax.ShapeDtypeStruct((N, L, C_pad), jnp.float32),   # conv out, even rows
            jax.ShapeDtypeStruct((N, L, C_pad), jnp.float32),   # conv out, odd rows
            jax.ShapeDtypeStruct((1, C_pad), jnp.float32),      # sum(z) over (N, 2L)
            jax.ShapeDtypeStruct((1, C_pad), jnp.float32),      # sum(z*z)
        ),
        compiler_params=pltpu.CompilerParams(
            dimension_semantics=("arbitrary",),   # BN-stat accumulator across batch axis
            vmem_limit_bytes=_vmem_limit_bytes(),
        ),
    )(z, a, c, w4, b)


def _final_conv_call(z, a, c, wk, b):
    N, L, C_pad = z.shape
    K = wk.shape[0]
    kernel = make_final_conv_kernel(L, C_pad, K)
    row_spec = pl.BlockSpec((1, L, C_pad), lambda n: (n, 0, 0))
    vec_spec = pl.BlockSpec((1, C_pad), lambda n: (0, 0))
    w_spec = pl.BlockSpec((K, C_pad, C_pad), lambda n: (0, 0, 0))
    return pl.pallas_call(
        kernel,
        grid=(N,),
        in_specs=[row_spec, vec_spec, vec_spec, w_spec, vec_spec],
        out_specs=row_spec,
        out_shape=jax.ShapeDtypeStruct((N, L, C_pad), jnp.float32),
        compiler_params=pltpu.CompilerParams(
            dimension_semantics=("parallel",),    # no accumulator here; megacore-safe
            vmem_limit_bytes=_vmem_limit_bytes(),
        ),
    )(z, a, c, wk, b)


# -------------------------------------------------------------------- parameter folding


def _pad_row(v, C_pad):
    v = v.reshape(1, -1).astype(jnp.float32)
    return jnp.pad(v, ((0, 0), (0, C_pad - v.shape[1])))


def _fold_block_params(w, b, gamma, beta, C_pad):
    """torch Conv1d weight (C_out, C_in, 3) -> 4 folded upsample+conv tap matrices."""
    C_out, C_in, k = w.shape
    assert k == 3
    t = [jnp.transpose(w[:, :, i]) for i in range(3)]                # (C_in, C_out) taps
    taps = jnp.stack([t[0], t[1] + t[2], t[0] + t[1], t[2]])         # (4, C_in, C_out)
    taps = jnp.pad(taps, ((0, 0), (0, C_pad - C_in), (0, C_pad - C_out)))
    return (taps.astype(jnp.bfloat16), _pad_row(b, C_pad),
            _pad_row(gamma, C_pad), _pad_row(beta, C_pad))


def _fold_final_params(w, b, C_pad):
    C_out, C_in, K = w.shape
    taps = jnp.stack([jnp.transpose(w[:, :, i]) for i in range(K)])  # (K, C_in, C_out)
    taps = jnp.pad(taps, ((0, 0), (0, C_pad - C_in), (0, C_pad - C_out)))
    return taps.astype(jnp.bfloat16), _pad_row(b, C_pad)


# ---------------------------------------------------------------------------- forward


def expand_forward(x_ncl, up_params, final_params):
    """Expand / ConvUpsample forward.  x_ncl: (N, C, L0) like PyTorch; returns (N, C, L_end)."""
    N, C, L = x_ncl.shape
    C_pad = ((C + 127) // 128) * 128

    # channels-last, lane-dense activations: (N, C, L) -> (N, L, Cp)
    z = jnp.transpose(x_ncl, (0, 2, 1)).astype(jnp.float32)
    z = jnp.pad(z, ((0, 0), (0, 0), (0, C_pad - C)))

    # identity affine placeholders for the first block (its input is the raw x)
    a = jnp.ones((1, C_pad), jnp.float32)
    c = jnp.zeros((1, C_pad), jnp.float32)

    for t, (w, b, gamma, beta) in enumerate(up_params):
        w4, b_p, g_p, bt_p = _fold_block_params(w, b, gamma, beta, C_pad)
        z_e, z_o, s, ss = _upsample_block_call(z, a, c, w4, b_p,
                                               apply_input_act=(t > 0))

        # interleave even/odd conv rows -> (N, 2L, Cp); XLA-side layout plumbing only
        z = jnp.stack([z_e, z_o], axis=2).reshape(N, 2 * L, C_pad)
        L = 2 * L

        # fold BatchNorm1d (training batch stats, biased variance) into a (1, Cp) affine;
        # it is applied inside the NEXT kernel, fused with that kernel's conv.
        r = float(N * L)
        mean = s / r
        var = ss / r - mean * mean
        a = g_p * lax.rsqrt(var + BN_EPS)
        c = bt_p - mean * a

    wf, bf = final_params
    wk, bf_p = _fold_final_params(wf, bf, C_pad)
    out = _final_conv_call(z, a, c, wk, bf_p)

    out = out[:, :, :C]
    return jnp.transpose(out, (0, 2, 1))


# ------------------------------------------------------------ reference & param init


def reference_forward(x_ncl, up_params, final_params):
    """Pure-jnp reference with the PyTorch module's semantics (f32 everywhere)."""
    x = jnp.transpose(x_ncl, (0, 2, 1)).astype(jnp.float32)           # (N, L, C)
    for (w, b, gamma, beta) in up_params:
        x = jnp.repeat(x, 2, axis=1)                                   # Upsample(2, nearest)
        xp = jnp.pad(x, ((0, 0), (1, 1), (0, 0)))                      # Conv1d(C, C, 3, p=1)
        y = (xp[:, :-2] @ w[:, :, 0].T + xp[:, 1:-1] @ w[:, :, 1].T
             + xp[:, 2:] @ w[:, :, 2].T) + b
        mean = jnp.mean(y, axis=(0, 1))                                # BN, training stats
        var = jnp.var(y, axis=(0, 1))
        y = (y - mean) * lax.rsqrt(var + BN_EPS) * gamma + beta
        x = jnp.where(y > 0, y, LEAKY_SLOPE * y)                       # LeakyReLU(0.2)
    wf, bf = final_params
    K = wf.shape[2]
    p = K // 2
    L = x.shape[1]
    xp = jnp.pad(x, ((0, 0), (p, p), (0, 0)))
    y = sum(xp[:, k:k + L] @ wf[:, :, k].T for k in range(K)) + bf
    return jnp.transpose(y, (0, 2, 1))


def init_expand_params(key, channels, n_layers, final_kernel_size=3):
    """Deterministic synthetic parameters in torch layout (Conv1d weight: (C_out, C_in, K))."""
    keys = jax.random.split(key, n_layers + 1)
    up = []
    s3 = 1.0 / (3.0 * channels) ** 0.5
    for t in range(n_layers):
        k1, k2 = jax.random.split(keys[t])
        w = jax.random.uniform(k1, (channels, channels, 3), jnp.float32, -s3, s3)
        b = jax.random.uniform(k2, (channels,), jnp.float32, -s3, s3)
        up.append((w, b, jnp.ones((channels,), jnp.float32),
                   jnp.zeros((channels,), jnp.float32)))
    k1, k2 = jax.random.split(keys[-1])
    sf = 1.0 / (float(final_kernel_size) * channels) ** 0.5
    wf = jax.random.uniform(k1, (channels, channels, final_kernel_size), jnp.float32, -sf, sf)
    bf = jax.random.uniform(k2, (channels,), jnp.float32, -sf, sf)
    return up, (wf, bf)


if __name__ == "__main__":
    # Real module: channels = model_dim = 128, start_size = 128, end_size = 2**15.
    # Small, shape-consistent demo: same (lane-dense) channel count, shorter sequence.
    N, C = 2, 128
    start_size, end_size = 16, 128
    n_layers = 0
    s = start_size
    while s < end_size:
        s *= 2
        n_layers += 1

    key = jax.random.PRNGKey(0)
    key, xk, pk = jax.random.split(key, 3)
    x = jax.random.normal(xk, (N, C, start_size), jnp.float32)        # PyTorch-style (N, C, L)
    up_params, final_params = init_expand_params(pk, C, n_layers)

    out = jax.block_until_ready(expand_forward(x, up_params, final_params))
    assert out.shape == (N, C, end_size), out.shape

    ref = jax.block_until_ready(reference_forward(x, up_params, final_params))
    err = float(jnp.max(jnp.abs(out - ref)))
    assert err < 1e-1, f"max abs err {err}"
    print("KERNEL_OK")
</pallas_src>

<mosaic_0001>
module attributes {stable_mosaic.version = 11 : i64} {
  func.func @kernel(%arg0: i32, %arg1: memref<1x16x128xf32, #tpu.memory_space<vmem>>, %arg2: memref<1x128xf32, #tpu.memory_space<vmem>>, %arg3: memref<1x128xf32, #tpu.memory_space<vmem>>, %arg4: memref<4x128x128xbf16, #tpu.memory_space<vmem>>, %arg5: memref<1x128xf32, #tpu.memory_space<vmem>>, %arg6: memref<1x16x128xf32, #tpu.memory_space<vmem>>, %arg7: memref<1x16x128xf32, #tpu.memory_space<vmem>>, %arg8: memref<1x128xf32, #tpu.memory_space<vmem>>, %arg9: memref<1x128xf32, #tpu.memory_space<vmem>>) attributes {dimension_semantics = [#tpu.dimension_semantics<arbitrary>], iteration_bounds = array<i64: 2>, scalar_prefetch = 0 : i64, scratch_operands = 0 : i64, tpu.core_type = #tpu.core_type<tc>, window_params = [{transform_indices = @transform_0, window_bounds = array<i64: 1, 16, 128>}, {pipeline_mode = #tpu.pipeline_mode<synchronous>, transform_indices = @transform_1, window_bounds = array<i64: 1, 128>}, {pipeline_mode = #tpu.pipeline_mode<synchronous>, transform_indices = @transform_2, window_bounds = array<i64: 1, 128>}, {pipeline_mode = #tpu.pipeline_mode<synchronous>, transform_indices = @transform_3, window_bounds = array<i64: 4, 128, 128>}, {pipeline_mode = #tpu.pipeline_mode<synchronous>, transform_indices = @transform_4, window_bounds = array<i64: 1, 128>}, {transform_indices = @transform_5, window_bounds = array<i64: 1, 16, 128>}, {transform_indices = @transform_6, window_bounds = array<i64: 1, 16, 128>}, {pipeline_mode = #tpu.pipeline_mode<synchronous>, transform_indices = @transform_7, window_bounds = array<i64: 1, 128>}, {pipeline_mode = #tpu.pipeline_mode<synchronous>, transform_indices = @transform_8, window_bounds = array<i64: 1, 128>}]} {
    %c0 = arith.constant 0 : index
    %c0_0 = arith.constant 0 : index
    %c0_1 = arith.constant 0 : index
    %0 = vector.load %arg1[%c0, %c0_0, %c0_1] : memref<1x16x128xf32, #tpu.memory_space<vmem>>, vector<1x16x128xf32>
    %1 = vector.shape_cast %0 : vector<1x16x128xf32> to vector<16x128xf32>
    %2 = tpu.iota {dimensions = array<i32: 0>} : vector<16x1xi32>
    %c1_i32 = arith.constant 1 : i32
    %3 = vector.broadcast %c1_i32 : i32 to vector<16x1xi32>
    %4 = arith.cmpi sge, %2, %3 : vector<16x1xi32>
    %c1_i32_2 = arith.constant 1 : i32
    %5 = tpu.dynamic_rotate %1 by %c1_i32_2 dim 0 : vector<16x128xf32>, i32 -> vector<16x128xf32>
    %cst = arith.constant 0.000000e+00 : f32
    %6 = vector.shape_cast %4 : vector<16x1xi1> to vector<16x1xi1>
    %7 = vector.broadcast %6 : vector<16x1xi1> to vector<16x128xi1>
    %8 = vector.broadcast %cst : f32 to vector<16x128xf32>
    %9 = arith.select %7, %5, %8 : vector<16x128xi1>, vector<16x128xf32>
    %c14_i32 = arith.constant 14 : i32
    %10 = vector.broadcast %c14_i32 : i32 to vector<16x1xi32>
    %11 = arith.cmpi sle, %2, %10 : vector<16x1xi32>
    %c15_i32 = arith.constant 15 : i32
    %12 = tpu.dynamic_rotate %1 by %c15_i32 dim 0 : vector<16x128xf32>, i32 -> vector<16x128xf32>
    %cst_3 = arith.constant 0.000000e+00 : f32
    %13 = vector.shape_cast %11 : vector<16x1xi1> to vector<16x1xi1>
    %14 = vector.broadcast %13 : vector<16x1xi1> to vector<16x128xi1>
    %15 = vector.broadcast %cst_3 : f32 to vector<16x128xf32>
    %16 = arith.select %14, %12, %15 : vector<16x128xi1>, vector<16x128xf32>
    %17 = arith.truncf %1 : vector<16x128xf32> to vector<16x128xbf16>
    %18 = arith.truncf %9 : vector<16x128xf32> to vector<16x128xbf16>
    %19 = arith.truncf %16 : vector<16x128xf32> to vector<16x128xbf16>
    %c0_4 = arith.constant 0 : index
    %c0_5 = arith.constant 0 : index
    %20 = vector.load %arg5[%c0_4, %c0_5] : memref<1x128xf32, #tpu.memory_space<vmem>>, vector<1x128xf32>
    %c0_6 = arith.constant 0 : index
    %c0_7 = arith.constant 0 : index
    %c0_8 = arith.constant 0 : index
    %21 = vector.load %arg4[%c0_6, %c0_7, %c0_8] : memref<4x128x128xbf16, #tpu.memory_space<vmem>>, vector<1x128x128xbf16>
    %22 = vector.shape_cast %21 : vector<1x128x128xbf16> to vector<128x128xbf16>
    %cst_9 = arith.constant dense<0.000000e+00> : vector<16x128xf32>
    %23 = tpu.matmul %18, %22, %cst_9 {dimension_numbers = #tpu.dot_dimension_numbers<[1], [0], [0], [1], [0, 0, 1, 1], [], []>} : vector<16x128xbf16>, vector<128x128xbf16>, vector<16x128xf32> -> vector<16x128xf32>
    %c1 = arith.constant 1 : index
    %c0_10 = arith.constant 0 : index
    %c0_11 = arith.constant 0 : index
    %24 = vector.load %arg4[%c1, %c0_10, %c0_11] : memref<4x128x128xbf16, #tpu.memory_space<vmem>>, vector<1x128x128xbf16>
    %25 = vector.shape_cast %24 : vector<1x128x128xbf16> to vector<128x128xbf16>
    %cst_12 = arith.constant dense<0.000000e+00> : vector<16x128xf32>
    %26 = tpu.matmul %17, %25, %cst_12 {dimension_numbers = #tpu.dot_dimension_numbers<[1], [0], [0], [1], [0, 0, 1, 1], [], []>} : vector<16x128xbf16>, vector<128x128xbf16>, vector<16x128xf32> -> vector<16x128xf32>
    %27 = arith.addf %23, %26 : vector<16x128xf32>
    %28 = vector.broadcast %20 : vector<1x128xf32> to vector<16x128xf32>
    %29 = arith.addf %27, %28 : vector<16x128xf32>
    %c2 = arith.constant 2 : index
    %c0_13 = arith.constant 0 : index
    %c0_14 = arith.constant 0 : index
    %30 = vector.load %arg4[%c2, %c0_13, %c0_14] : memref<4x128x128xbf16, #tpu.memory_space<vmem>>, vector<1x128x128xbf16>
    %31 = vector.shape_cast %30 : vector<1x128x128xbf16> to vector<128x128xbf16>
    %cst_15 = arith.constant dense<0.000000e+00> : vector<16x128xf32>
    %32 = tpu.matmul %17, %31, %cst_15 {dimension_numbers = #tpu.dot_dimension_numbers<[1], [0], [0], [1], [0, 0, 1, 1], [], []>} : vector<16x128xbf16>, vector<128x128xbf16>, vector<16x128xf32> -> vector<16x128xf32>
    %c3 = arith.constant 3 : index
    %c0_16 = arith.constant 0 : index
    %c0_17 = arith.constant 0 : index
    %33 = vector.load %arg4[%c3, %c0_16, %c0_17] : memref<4x128x128xbf16, #tpu.memory_space<vmem>>, vector<1x128x128xbf16>
    %34 = vector.shape_cast %33 : vector<1x128x128xbf16> to vector<128x128xbf16>
    %cst_18 = arith.constant dense<0.000000e+00> : vector<16x128xf32>
    %35 = tpu.matmul %19, %34, %cst_18 {dimension_numbers = #tpu.dot_dimension_numbers<[1], [0], [0], [1], [0, 0, 1, 1], [], []>} : vector<16x128xbf16>, vector<128x128xbf16>, vector<16x128xf32> -> vector<16x128xf32>
    %36 = arith.addf %32, %35 : vector<16x128xf32>
    %37 = vector.broadcast %20 : vector<1x128xf32> to vector<16x128xf32>
    %38 = arith.addf %36, %37 : vector<16x128xf32>
    %c0_19 = arith.constant 0 : index
    %c0_20 = arith.constant 0 : index
    %c0_21 = arith.constant 0 : index
    %39 = vector.load %arg6[%c0_19, %c0_20, %c0_21] : memref<1x16x128xf32, #tpu.memory_space<vmem>>, vector<1x16x128xf32>
    %40 = vector.shape_cast %39 : vector<1x16x128xf32> to vector<16x128xf32>
    %41 = vector.shape_cast %29 : vector<16x128xf32> to vector<1x16x128xf32>
    tpu.vector_store %arg6[%c0_19, %c0_20, %c0_21], %41 {strides = array<i32>} : memref<1x16x128xf32, #tpu.memory_space<vmem>>, vector<1x16x128xf32>,
    %c0_22 = arith.constant 0 : index
    %c0_23 = arith.constant 0 : index
    %c0_24 = arith.constant 0 : index
    %42 = vector.load %arg7[%c0_22, %c0_23, %c0_24] : memref<1x16x128xf32, #tpu.memory_space<vmem>>, vector<1x16x128xf32>
    %43 = vector.shape_cast %42 : vector<1x16x128xf32> to vector<16x128xf32>
    %44 = vector.shape_cast %38 : vector<16x128xf32> to vector<1x16x128xf32>
    tpu.vector_store %arg7[%c0_22, %c0_23, %c0_24], %44 {strides = array<i32>} : memref<1x16x128xf32, #tpu.memory_space<vmem>>, vector<1x16x128xf32>,
    %c0_i32 = arith.constant 0 : i32
    %45 = arith.cmpi eq, %arg0, %c0_i32 : i32
    %46 = arith.extui %45 : i1 to i32
    %c0_i32_25 = arith.constant 0 : i32
    %47 = arith.cmpi ne, %46, %c0_i32_25 : i32
    scf.if %47 {
      %cst_38 = arith.constant 0.000000e+00 : f32
      %66 = vector.broadcast %cst_38 : f32 to vector<1x128xf32>
      %c0_39 = arith.constant 0 : index
      %c0_40 = arith.constant 0 : index
      %67 = vector.load %arg8[%c0_39, %c0_40] : memref<1x128xf32, #tpu.memory_space<vmem>>, vector<1x128xf32>
      tpu.vector_store %arg8[%c0_39, %c0_40], %66 {strides = array<i32>} : memref<1x128xf32, #tpu.memory_space<vmem>>, vector<1x128xf32>,
      %cst_41 = arith.constant 0.000000e+00 : f32
      %68 = vector.broadcast %cst_41 : f32 to vector<1x128xf32>
      %c0_42 = arith.constant 0 : index
      %c0_43 = arith.constant 0 : index
      %69 = vector.load %arg9[%c0_42, %c0_43] : memref<1x128xf32, #tpu.memory_space<vmem>>, vector<1x128xf32>
      tpu.vector_store %arg9[%c0_42, %c0_43], %68 {strides = array<i32>} : memref<1x128xf32, #tpu.memory_space<vmem>>, vector<1x128xf32>,
    } else {
    }
    %c0_26 = arith.constant 0 : index
    %c0_27 = arith.constant 0 : index
    %48 = vector.load %arg8[%c0_26, %c0_27] : memref<1x128xf32, #tpu.memory_space<vmem>>, vector<1x128xf32>
    %cst_28 = arith.constant dense<0.000000e+00> : vector<128xf32>
    %49 = vector.multi_reduction <add>, %29, %cst_28 [0] : vector<16x128xf32> to vector<128xf32>
    %50 = vector.shape_cast %49 : vector<128xf32> to vector<1x128xf32>
    %cst_29 = arith.constant dense<0.000000e+00> : vector<128xf32>
    %51 = vector.multi_reduction <add>, %38, %cst_29 [0] : vector<16x128xf32> to vector<128xf32>
    %52 = vector.shape_cast %51 : vector<128xf32> to vector<1x128xf32>
    %53 = arith.addf %50, %52 : vector<1x128xf32>
    %54 = arith.addf %48, %53 : vector<1x128xf32>
    %c0_30 = arith.constant 0 : index
    %c0_31 = arith.constant 0 : index
    %55 = vector.load %arg8[%c0_30, %c0_31] : memref<1x128xf32, #tpu.memory_space<vmem>>, vector<1x128xf32>
    tpu.vector_store %arg8[%c0_30, %c0_31], %54 {strides = array<i32>} : memref<1x128xf32, #tpu.memory_space<vmem>>, vector<1x128xf32>,
    %c0_32 = arith.constant 0 : index
    %c0_33 = arith.constant 0 : index
    %56 = vector.load %arg9[%c0_32, %c0_33] : memref<1x128xf32, #tpu.memory_space<vmem>>, vector<1x128xf32>
    %57 = arith.mulf %29, %29 : vector<16x128xf32>
    %cst_34 = arith.constant dense<0.000000e+00> : vector<128xf32>
    %58 = vector.multi_reduction <add>, %57, %cst_34 [0] : vector<16x128xf32> to vector<128xf32>
    %59 = vector.shape_cast %58 : vector<128xf32> to vector<1x128xf32>
    %60 = arith.mulf %38, %38 : vector<16x128xf32>
    %cst_35 = arith.constant dense<0.000000e+00> : vector<128xf32>
    %61 = vector.multi_reduction <add>, %60, %cst_35 [0] : vector<16x128xf32> to vector<128xf32>
    %62 = vector.shape_cast %61 : vector<128xf32> to vector<1x128xf32>
    %63 = arith.addf %59, %62 : vector<1x128xf32>
    %64 = arith.addf %56, %63 : vector<1x128xf32>
    %c0_36 = arith.constant 0 : index
    %c0_37 = arith.constant 0 : index
    %65 = vector.load %arg9[%c0_36, %c0_37] : memref<1x128xf32, #tpu.memory_space<vmem>>, vector<1x128xf32>
    tpu.vector_store %arg9[%c0_36, %c0_37], %64 {strides = array<i32>} : memref<1x128xf32, #tpu.memory_space<vmem>>, vector<1x128xf32>,
    return
  }
  func.func @transform_0(%arg0: i32) -> (i32, i32, i32) {
    %c0_i32 = arith.constant 0 : i32
    %c0_i32_0 = arith.constant 0 : i32
    %c0_i32_1 = arith.constant 0 : i32
    return %arg0, %c0_i32, %c0_i32_0 : i32, i32, i32
  }
  func.func @transform_1(%arg0: i32) -> (i32, i32) {
    %c0_i32 = arith.constant 0 : i32
    %c0_i32_0 = arith.constant 0 : i32
    %c0_i32_1 = arith.constant 0 : i32
    return %c0_i32, %c0_i32_0 : i32, i32
  }
  func.func @transform_2(%arg0: i32) -> (i32, i32) {
    %c0_i32 = arith.constant 0 : i32
    %c0_i32_0 = arith.constant 0 : i32
    %c0_i32_1 = arith.constant 0 : i32
    return %c0_i32, %c0_i32_0 : i32, i32
  }
  func.func @transform_3(%arg0: i32) -> (i32, i32, i32) {
    %c0_i32 = arith.constant 0 : i32
    %c0_i32_0 = arith.constant 0 : i32
    %c0_i32_1 = arith.constant 0 : i32
    %c0_i32_2 = arith.constant 0 : i32
    return %c0_i32, %c0_i32_0, %c0_i32_1 : i32, i32, i32
  }
  func.func @transform_4(%arg0: i32) -> (i32, i32) {
    %c0_i32 = arith.constant 0 : i32
    %c0_i32_0 = arith.constant 0 : i32
    %c0_i32_1 = arith.constant 0 : i32
    return %c0_i32, %c0_i32_0 : i32, i32
  }
  func.func @transform_5(%arg0: i32) -> (i32, i32, i32) {
    %c0_i32 = arith.constant 0 : i32
    %c0_i32_0 = arith.constant 0 : i32
    %c0_i32_1 = arith.constant 0 : i32
    return %arg0, %c0_i32, %c0_i32_0 : i32, i32, i32
  }
  func.func @transform_6(%arg0: i32) -> (i32, i32, i32) {
    %c0_i32 = arith.constant 0 : i32
    %c0_i32_0 = arith.constant 0 : i32
    %c0_i32_1 = arith.constant 0 : i32
    return %arg0, %c0_i32, %c0_i32_0 : i32, i32, i32
  }
  func.func @transform_7(%arg0: i32) -> (i32, i32) {
    %c0_i32 = arith.constant 0 : i32
    %c0_i32_0 = arith.constant 0 : i32
    %c0_i32_1 = arith.constant 0 : i32
    return %c0_i32, %c0_i32_0 : i32, i32
  }
  func.func @transform_8(%arg0: i32) -> (i32, i32) {
    %c0_i32 = arith.constant 0 : i32
    %c0_i32_0 = arith.constant 0 : i32
    %c0_i32_1 = arith.constant 0 : i32
    return %c0_i32, %c0_i32_0 : i32, i32
  }
}

</mosaic_0001>

<bundles_post_ra>
// kernel: tpu_custom_call.1
= control target key start
LH: loop header
LB: loop body
LE: loop exit
PB: predicated region body
PF: predicated region fallthrough
CT: control target
= control target key end

     0   :  { %14 = vsyncpa [#allocation3], 0  ;;  %s2018_s0 = inlined_call_operand.hbm [shape: f32[2,16,128], index: 0, kind: input, shape index: {}]   ;;  %s2019_s1 = inlined_call_operand.vmem [shape: f32[1,128], index: 1, kind: input, shape index: {}]   ;;  %s2020_s2 = inlined_call_operand.vmem [shape: f32[1,128], index: 2, kind: input, shape index: {}]   ;;  %s2021_s3 = inlined_call_operand.hbm [shape: bf16[4,128,128], index: 3, kind: input, shape index: {}]   ;;  %s2022_s4 = inlined_call_operand.vmem [shape: f32[1,128], index: 4, kind: input, shape index: {}]   ;;  %s2023_s5 = inlined_call_operand.hbm [shape: f32[2,16,128], index: 5, kind: output, shape index: {0}]   ;;  %s2024_s6 = inlined_call_operand.hbm [shape: f32[2,16,128], index: 6, kind: output, shape index: {1}]   ;;  %s2025_s7 = inlined_call_operand.hbm [shape: f32[1,128], index: 7, kind: output, shape index: {2}]   ;;  %s2026_s8 = inlined_call_operand.hbm [shape: f32[1,128], index: 8, kind: output, shape index: {3}]  }
   0x1   :  { %16 = vsyncpa [#allocation3 + $0x1], 0 }
   0x2   :  { %17 = vsyncpa [#allocation6], 0 }
   0x3   :  { %18 = vsyncpa [#allocation4], 0 }
   0x4   :  { %20 = vsyncpa [#allocation4 + $0x1], 0 }
   0x5   :  { %21 = vsyncpa [#allocation9], 0 }
   0x6   :  { %23 = vsyncpa [#allocation9 + $0x1], 0 }
   0x7   :  { %24 = vsyncpa [#allocation12], 0  ;;  %s1641_s2 = smov 0   ;;  %s1643_s26 = smov 0  }
   0x8   :  { %s1645_s27 = smov 0   ;;  %s1647_s28 = smov 0  }
   0x9 LB: > { %s1662_s29 = sadd.s32 4294967295, %s1578_s28   ;;  %s1057_s30 = sadd.s32 4294967294, %s1578_s28   ;;  %s1578_s28 = sphi %s1647_s28, %s2056_s28   ;;  %s1574_s27 = sphi %s1645_s27, %s2055_s27   ;;  %s1570_s26 = sphi %s1643_s26, %s2054_s26   ;;  %s1566_s2 = sphi %s1641_s2, %s2053_s2  }
   0xa   : > { %p50_p0 = scmp.ne.s32.totalorder %s1570_s26, %s1566_s2  ;;  %p2027_p1 = scmp.eq.s32.totalorder %s1662_s29, 0 }
   0xb   : > { %p164_p3 = scmp.eq.s32.totalorder %s1057_s30, 1  ;;  %p1058_p5 = scmp.ge.s32.totalorder %s1578_s28, 1 }
   0xc   : > { %p1673_p4 = por %p2027_p1, %p50_p0  ;;  %p239_p7 = scmp.lt.s32.totalorder %s1578_s28, 3 }
   0xd   : > { %p1678_p6 = por %p164_p3, %p50_p0  ;;  %s1580_s12 = smov [#allocation5]  }
   0xe   : > { %s2030_s9 = scalar_select %p1673_p4, 1, 0 }
   0xf   : > { %s2031_s10 = scalar_select %p1678_p6, 1, 0 }
  0x10   : > { %p1684_p9 = pnand %p1058_p5, %p239_p7  ;;  %s257_s13 = sshll.u32 %s1580_s12, 4  ;;  %s1688_s13 = int_to_ptr.vmem [resolvable:$true] %s257_s13 }
  0x11   : > { %s1700_s15 = sadd.s32 1, %s1578_s28   ;;  %s37_s16 = sadd.s32 1, %s1574_s27 }
  0x12   : > { %s2032_s11 = scalar_select %p1684_p9, 1, 0 }
  0x13   : > { %p1258_p10 = pneg %p1684_p9  ;;  %s34_s17 = ssub.s32 %s1578_s28, %s1700_s15 }
  0x14   : > { %s1358_s20 = scalar_lea.hbm %s2021_s3, 4096 }
  0x15   : > { %p1695_p12 = pnand %p1258_p10, %p2027_p1  ;;  %p1359_p13 = scmp.ne.s32.totalorder %s2021_s3, %s1358_s20 }
  0x16   : > { %p1365_p7 = scmp.lt.u32.totalorder %s1358_s20, %s2021_s3 }
  0x17   : > { %p1360_p0 = pneg %p1695_p12 }
  0x19   : > { %p1361_p3 = pnand %p1360_p0, %p1359_p13 }
  0x1b   : > { %p1362_p5 = pneg %p1361_p3 }
  0x1d   : > { %p1367_p10 = pnand %p1365_p7, %p1362_p5 }
  0x1f   : > { %1370 = shalt.err (!%p1367_p10)
}
  0x20   : > { %s1371_s25 = scalar_lea.vmem %s1688_s13, 4096  ;;  %p1379_p2 = scmp.lt.s32.totalorder %s1688_s13, %s1688_s13 }
  0x21   : > { %p1372_p11 = scmp.ne.s32.totalorder %s1688_s13, %s1371_s25  ;;  %p1380_p6 = scmp.lt.s32.totalorder %s1371_s25, %s1371_s25 }
  0x23   : > { %p1374_p8 = pnand %p1372_p11, %p1360_p0  ;;  %p1381_p4 = por %p1380_p6, %p1379_p2 }
  0x25   : > { %p1375_p1 = pneg %p1374_p8 }
  0x27   : > { %p1382_p9 = pnand %p1381_p4, %p1375_p1 }
  0x29   : > { %1385 = shalt.err (!%p1382_p9)
}
  0x2a   : > { %s1581_s1 = smov 64   ;;  %s1582_s12 = smov 4  }
  0x2b   : > { %1261 = dma.hbm_to_vmem [thread:$0]  (!%p1695_p12), %s2021_s3, 4096, %s1688_s13, [#allocation6], %s1581_s1, %s1581_s1, %s1582_s12  }
  0x2c   : > { %p35_p2 = scmp.eq.s32.totalorder %s34_s17, 0  ;;  %p44_p1 = scmp.ne.s32.totalorder %s1574_s27, %s1570_s26 }
  0x2d   : > { %p45_p4 = scmp.eq.s32.totalorder %s1578_s28, 0  ;;  %p1274_p6 = scmp.lt.s32.totalorder %s1578_s28, 2 }
  0x2e   : > { %s1731_s20 = scalar_select %p35_p2, %s1574_s27, %s37_s16  }
  0x2f   : > { %p46_p8 = por %p45_p4, %p44_p1  ;;  %p2034_p9 = scmp.eq.s32.totalorder %s1662_s29, 1 }
  0x30   : > { %s274_s22 = sand.u32 1, %s1574_s27   ;;  %s1121_s23 = sshll.u32 %s1578_s28, 8 }
  0x31   : > { %p1735_p11 = por %p2034_p9, %p44_p1  ;;  %s1061_s24 = sshll.u32 %s274_s22, 4 }
  0x32   : > { %s1744_s18 = scalar_lea.hbm %s2018_s0, %s1121_s23  ;;  %s278_s13 = scalar_lea.vmem [#allocation2], %s1061_s24 }
  0x33   : > { %s285_s16 = sshll.u32 %s278_s13, 4  ;;  %p1746_p12 = pnand %p1274_p6, %p46_p8  ;;  %s1750_s16 = int_to_ptr.vmem [resolvable:$true] %s285_s16 }
  0x34   : > { %s1752_s1 = scalar_lea.sflag [#allocation3], %s274_s22  ;;  %s1386_s12 = scalar_lea.hbm %s1744_s18, 256 }
  0x35   : > { %p1387_p13 = scmp.ne.s32.totalorder %s1744_s18, %s1386_s12  ;;  %p1388_p0 = pneg %p1746_p12 }
  0x36   : > { %s1391_s24 = scalar_lea.hbm %s2018_s0, 512  ;;  %p1392_p7 = scmp.lt.u32.totalorder %s1744_s18, %s2018_s0 }
  0x37   : > { %p1389_p3 = pnand %p1388_p0, %p1387_p13  ;;  %p1393_p10 = scmp.lt.u32.totalorder %s1391_s24, %s1386_s12 }
  0x38   : > { %p1395_p1 = scmp.lt.u32.totalorder %s1386_s12, %s1744_s18 }
  0x39   : > { %p1390_p5 = pneg %p1389_p3  ;;  %p1394_p2 = por %p1393_p10, %p1392_p7 }
  0x3b   : > { %p1396_p4 = por %p1395_p1, %p1394_p2 }
  0x3d   : > { %p1397_p6 = pnand %p1396_p4, %p1390_p5 }
  0x3f   : > { %1400 = shalt.err (!%p1397_p6)
}
  0x40   : > { %s1401_s22 = scalar_lea.vmem %s1750_s16, 256  ;;  %s1583_s13 = smov [#allocation2]  }
  0x41   : > { %p1402_p8 = scmp.ne.s32.totalorder %s1750_s16, %s1401_s22  ;;  %s1406_s19 = sshll.u32 %s1583_s13, 4  ;;  %s1407_s19 = int_to_ptr.vmem [resolvable:$false] %s1406_s19 }
  0x42   : > { %s1408_s23 = scalar_lea.vmem %s1407_s19, 512  ;;  %p1409_p3 = scmp.lt.s32.totalorder %s1750_s16, %s1407_s19 }
  0x43   : > { %p1404_p9 = pnand %p1402_p8, %p1388_p0  ;;  %p1410_p7 = scmp.lt.s32.totalorder %s1408_s23, %s1401_s22 }
  0x45   : > { %p1405_p13 = pneg %p1404_p9  ;;  %p1411_p10 = por %p1410_p7, %p1409_p3 }
  0x47   : > { %p1412_p2 = pnand %p1411_p10, %p1405_p13 }
  0x49   : > { %1415 = shalt.err (!%p1412_p2)
}
  0x4a   : > { %s1584_s12 = smov 128   ;;  %s1585_s24 = smov 8  }
  0x4b   : > { %1265 = dma.hbm_to_vmem [thread:$0]  (!%p1746_p12), %s1744_s18, 256, %s1750_s16, %s1752_s1, %s1584_s12, %s1584_s12, %s1585_s24  }
  0x4c   : > { %p2037_p0 = scmp.ne.s32.totalorder %s2032_s11, 0 }
  0x4d   : > { %s1783_s14 = sand.u32 (!%p2037_p0), 1, %s1570_s26   ;;  %p2038_p5 = scmp.ne.s32.totalorder (!%p2037_p0), %s2030_s9, 0 }
  0x4e   : > { %297 = sbr.rel (%p2037_p0) target bundleno = 475 (0x1db), region = 40  ;;  %s1786_s25 = sshll.u32 (!%p2037_p0), %s1783_s14, 4 }
  0x4f   : > { %s300_s22 = scalar_lea.sflag (!%p2037_p0), [#allocation3], %s1783_s14  ;;  %s303_s13 = scalar_lea.vmem (!%p2037_p0), [#allocation2], %s1786_s25 }
  0x55   : > { %1541 = dma.done.wait (%p2038_p5), %s300_s22, 256  }
  0x56   : > { %1543 = vsyncadd (%p2038_p5), %s300_s22, 4294967040  ;;  %p2039_p12 = scmp.eq.s32.totalorder %s1662_s29, 0 }
  0x58   : > { %1545 = dma.done.wait (%p2039_p12), [#allocation6], 4096   ;;  %p2040_p1 = pmov %p2039_p12 }
  0x59   : > { %v1586_v0 = vmov 0.0   ;;  %vm1587_vm0 = vmmov 0   ;;  %v1326_v1 = vld [vmem:[#allocation5 + $0x40] sm:$0xff]   ;;  %v1328_v3 = vld [vmem:[#allocation5 + $0x48] sm:$0xff]   ;;  %v1330_v5 = vld [vmem:[#allocation5 + $0x50] sm:$0xff]   ;;  %v348_v11 = vlaneseq  ;;  %vm1588_vm3 = vmmov 1  }
  0x5a   : > { %1547 = vsyncadd (%p2040_p1), [#allocation6], 4294963200  ;;  %1160 = vmatprep.subr.bf16.mxu0 %v1586_v0  ;;  %1180 = vmatprep.subr.bf16.mxu1 %v1586_v0  ;;  %v1327_v2 = vld [vmem:[#allocation5] sm:$0xff]   ;;  %v1329_v4 = vld [vmem:[#allocation5 + $0x8] sm:$0xff]   ;;  %s1868_s18 = scalar_lea.vmem [#allocation7], %s1786_s25  ;;  %s340_s16 = scalar_lea.vmem [#allocation8], %s1786_s25 }
  0x5b   : > { %1176 = vmatprep.mubr.msk.bf16.mxu0 %vm1587_vm0, %v1586_v0  ;;  %1196 = vmatprep.mubr.msk.bf16.mxu1 %vm1587_vm0, %v1586_v0  ;;  %v1331_v6 = vld [vmem:[#allocation5 + $0x10] sm:$0xff]   ;;  %v1332_v7 = vld [vmem:[#allocation5 + $0x58] sm:$0xff]   ;;  %v1334_v9 = vld [vmem:[#allocation5 + $0x60] sm:$0xff]   ;;  %v1822_v16 = vshrl.u32 %v348_v11, 7  ;;  %p2041_p4 = scmp.ne.s32.totalorder %s1662_s29, 0 }
  0x5c   : > { %1161 = vmatpush3.bf16.msra.mxu0 %v1326_v1  ;;  %1181 = vmatpush3.bf16.msra.mxu1 %v1327_v2  ;;  %v1333_v8 = vld [vmem:[#allocation5 + $0x18] sm:$0xff]   ;;  %v1335_v10 = vld [vmem:[#allocation5 + $0x20] sm:$0xff]   ;;  %v1336_v12 = vld [vmem:[#allocation5 + $0x68] sm:$0xff]  }
  0x5d   : > { %1162 = vmatprep.subr.bf16.mxu0 %v1586_v0  ;;  %1182 = vmatprep.subr.bf16.mxu1 %v1586_v0  ;;  %v1337_v13 = vld [vmem:[#allocation5 + $0x28] sm:$0xff]   ;;  %v1815_v14 = vld [vmem:[%s303_s13] sm:$0xff]  ;;  %vm355_vm1 = vcmp.lt.s32.totalorder %v1822_v16, 1  ;;  %v1340_v21 = vld [vmem:[#allocation5 + $0x78] sm:$0xff]   ;;  %vm351_vm2 = vcmp.ge.s32.totalorder %v1822_v16, 1  ;;  %v350_v42 = vadd.s32 8, %v1822_v16 }
  0x5e   : > { %v1820_v15 = vld [vmem:[%s303_s13 + $0x8] sm:$0xff]  ;;  %v1338_v17 = vld [vmem:[#allocation5 + $0x70] sm:$0xff]   ;;  %v353_v19 = vrot.slane %v1815_v14, 7  ;;  %vm1085_vm4 = vmpackc.low %vm1588_vm3, %vm351_vm2  ;;  %v366_v39 = vrot.slane %v1815_v14, 1  ;;  %vm368_vm5 = vcmp.lt.s32.totalorder %v1822_v16, 7 }
  0x5f   : > { %v1339_v18 = vld [vmem:[#allocation5 + $0x30] sm:$0xff]   ;;  %v354_v20 = vrot.slane %v1820_v15, 7  ;;  %v1341_v22 = vld [vmem:[#allocation5 + $0x38] sm:$0xff]   ;;  %v1834_v25 = vpack.c.bf16 %v1820_v15, %v1815_v14  ;;  %v1342_v27 = vld [vmem:[#allocation5 + $0xc0] sm:$0xff]   ;;  %v367_v40 = vrot.slane %v1820_v15, 1  ;;  %vm365_vm6 = vcmp.le.s32.totalorder %v350_v42, 14 }
  0x60   : > { %1163 = vmatpush3.bf16.msra.mxu0 %v1328_v3  ;;  %1183 = vmatpush3.bf16.msra.mxu1 %v1329_v4  ;;  %v1343_v28 = vld [vmem:[#allocation5 + $0x80] sm:$0xff]   ;;  %v1344_v29 = vld [vmem:[#allocation5 + $0xc8] sm:$0xff]   ;;  %v1346_v31 = vld [vmem:[#allocation5 + $0xd0] sm:$0xff]  }
  0x61   : > { %1164 = vmatprep.subr.bf16.mxu0 %v1586_v0  ;;  %1184 = vmatprep.subr.bf16.mxu1 %v1586_v0  ;;  %v356_v23 = vsel %vm355_vm1, %v353_v19, %v354_v20  ;;  %v357_v24 = vsel %vm355_vm1, %v354_v20, %v353_v19  ;;  %v1345_v30 = vld [vmem:[#allocation5 + $0x88] sm:$0xff]   ;;  %v1347_v32 = vld [vmem:[#allocation5 + $0x90] sm:$0xff]   ;;  %v1348_v33 = vld [vmem:[#allocation5 + $0xd8] sm:$0xff]   ;;  %v369_v45 = vsel %vm368_vm5, %v366_v39, %v367_v40 }
  0x62   : > { %v1086_v26 = vpack.c.bf16 %v356_v23, %v357_v24  ;;  %v1349_v34 = vld [vmem:[#allocation5 + $0x98] sm:$0xff]   ;;  %v1350_v35 = vld [vmem:[#allocation5 + $0xe0] sm:$0xff]   ;;  %v1352_v37 = vld [vmem:[#allocation5 + $0xe8] sm:$0xff]   ;;  %v370_v46 = vsel %vm368_vm5, %v367_v40, %v366_v39 }
  0x63   : > { %v1351_v36 = vld [vmem:[#allocation5 + $0xa0] sm:$0xff]   ;;  %v1353_v38 = vld [vmem:[#allocation5 + $0xa8] sm:$0xff]   ;;  %v1354_v41 = vld [vmem:[#allocation5 + $0xf0] sm:$0xff]   ;;  %v1098_v48 = vpack.c.bf16 %v370_v46, %v369_v45 }
  0x64   : > { %1165 = vmatpush3.bf16.msra.mxu0 %v1330_v5  ;;  %1185 = vmatpush3.bf16.msra.mxu1 %v1331_v6  ;;  %v1355_v43 = vld [vmem:[#allocation5 + $0xb0] sm:$0xff]   ;;  %v1356_v44 = vld [vmem:[#allocation5 + $0xf8] sm:$0xff]   ;;  %vm1097_vm7 = vmpackc.low %vm365_vm6, %vm1588_vm3 }
  0x65   : > { %1166 = vmatprep.subr.bf16.mxu0 %v1586_v0  ;;  %1186 = vmatprep.subr.bf16.mxu1 %v1586_v0  ;;  %v1357_v47 = vld [vmem:[#allocation5 + $0xb8] sm:$0xff]   ;;  %v1088_v50 = vld [vmem:[%s2022_s4] ss:$0 sm:$0xff] }
  0x68   : > { %1167 = vmatpush3.bf16.msra.mxu0 %v1332_v7  ;;  %1187 = vmatpush3.bf16.msra.mxu1 %v1333_v8 }
  0x69   : > { %1168 = vmatprep.subr.bf16.mxu0 %v1586_v0  ;;  %1188 = vmatprep.subr.bf16.mxu1 %v1586_v0 }
  0x6c   : > { %1169 = vmatpush3.bf16.msra.mxu0 %v1334_v9  ;;  %1189 = vmatpush3.bf16.msra.mxu1 %v1335_v10  ;;  %v1589_v10 = vmov (!%p2041_p4), 0.0  }
  0x6d   : > { %1170 = vmatprep.subr.bf16.mxu0 %v1586_v0  ;;  %1190 = vmatprep.subr.bf16.mxu1 %v1586_v0  ;;  %822 = vst [vmem:[#allocation10] sm:$0x1] (!%p2041_p4), %v1589_v10  ;;  %823 = vst [vmem:[#allocation11] sm:$0x1] (!%p2041_p4), %v1589_v10 }
  0x70   : > { %1171 = vmatpush3.bf16.msra.mxu0 %v1336_v12  ;;  %1191 = vmatpush3.bf16.msra.mxu1 %v1337_v13 }
  0x71   : > { %1172 = vmatprep.subr.bf16.mxu0 %v1586_v0  ;;  %1192 = vmatprep.subr.bf16.mxu1 %v1586_v0 }
  0x74   : > { %1173 = vmatpush3.bf16.msra.mxu0 %v1338_v17  ;;  %1193 = vmatpush3.bf16.msra.mxu1 %v1339_v18 }
  0x75   : > { %1174 = vmatprep.subr.bf16.mxu0 %v1586_v0  ;;  %1194 = vmatprep.subr.bf16.mxu1 %v1586_v0 }
  0x78   : > { %1175 = vmatpush3.bf16.msra.mxu0 %v1340_v21  ;;  %1195 = vmatpush3.bf16.msra.mxu1 %v1341_v22 }
  0x79   : > { %1200 = vmatprep.subr.bf16.mxu0 %v1586_v0  ;;  %1220 = vmatprep.subr.bf16.mxu1 %v1586_v0 }
  0x7b   : > { %1177 = vmatmul.mubr.bf16.vlgmr.msra.gmra.mrb[0].mxu0 %v1834_v25  ;;  %1197 = vmatmul.mubr.msk.bf16.vlgmr.msra.gmra.mrb[0].mxu1 %vm1085_vm4, %v1086_v26 }
  0x7c   : > { %1201 = vmatpush3.bf16.msra.mxu0 %v1342_v27  ;;  %1221 = vmatpush3.bf16.msra.mxu1 %v1343_v28 }
  0x7d   : > { %1202 = vmatprep.subr.bf16.mxu0 %v1586_v0  ;;  %1222 = vmatprep.subr.bf16.mxu1 %v1586_v0 }
  0x7e   : > { %1216 = vmatprep.mubr.msk.bf16.mxu0 %vm1587_vm0, %v1586_v0  ;;  %1236 = vmatprep.mubr.msk.bf16.mxu1 %vm1587_vm0, %v1586_v0 }
  0x80   : > { %1203 = vmatpush3.bf16.msra.mxu0 %v1344_v29  ;;  %1223 = vmatpush3.bf16.msra.mxu1 %v1345_v30 }
  0x81   : > { %1204 = vmatprep.subr.bf16.mxu0 %v1586_v0  ;;  %1224 = vmatprep.subr.bf16.mxu1 %v1586_v0 }
  0x84   : > { %1205 = vmatpush3.bf16.msra.mxu0 %v1346_v31  ;;  %1225 = vmatpush3.bf16.msra.mxu1 %v1347_v32 }
  0x85   : > { %1206 = vmatprep.subr.bf16.mxu0 %v1586_v0  ;;  %1226 = vmatprep.subr.bf16.mxu1 %v1586_v0 }
  0x88   : > { %1207 = vmatpush3.bf16.msra.mxu0 %v1348_v33  ;;  %1227 = vmatpush3.bf16.msra.mxu1 %v1349_v34 }
  0x89   : > { %1208 = vmatprep.subr.bf16.mxu0 %v1586_v0  ;;  %1228 = vmatprep.subr.bf16.mxu1 %v1586_v0 }
  0x8c   : > { %1209 = vmatpush3.bf16.msra.mxu0 %v1350_v35  ;;  %1229 = vmatpush3.bf16.msra.mxu1 %v1351_v36 }
  0x8d   : > { %1210 = vmatprep.subr.bf16.mxu0 %v1586_v0  ;;  %1230 = vmatprep.subr.bf16.mxu1 %v1586_v0 }
  0x90   : > { %1211 = vmatpush3.bf16.msra.mxu0 %v1352_v37  ;;  %1231 = vmatpush3.bf16.msra.mxu1 %v1353_v38 }
  0x91   : > { %1212 = vmatprep.subr.bf16.mxu0 %v1586_v0  ;;  %1232 = vmatprep.subr.bf16.mxu1 %v1586_v0 }
  0x94   : > { %1213 = vmatpush3.bf16.msra.mxu0 %v1354_v41  ;;  %1233 = vmatpush3.bf16.msra.mxu1 %v1355_v43 }
  0x95   : > { %1214 = vmatprep.subr.bf16.mxu0 %v1586_v0  ;;  %1234 = vmatprep.subr.bf16.mxu1 %v1586_v0 }
  0x98   : > { %1215 = vmatpush3.bf16.msra.mxu0 %v1356_v44  ;;  %1235 = vmatpush3.bf16.msra.mxu1 %v1357_v47 }
  0x9b   : > { %1217 = vmatmul.mubr.msk.bf16.vlgmr.msra.gmra.mrb[4].mxu0 %vm1097_vm7, %v1098_v48  ;;  %1237 = vmatmul.mubr.bf16.vlgmr.msra.gmra.mrb[4].mxu1 %v1834_v25 }
 0x14e   : > { %v496_v49 = vpop.f32.mrb[0].mxu0  ;;  %v585_v51 = vpop.f32.mrb[0].mxu1 }
 0x14f   : > { %v1178_v52 = vpop.f32.mrb[1].mxu0  ;;  %v586_v53 = vadd.f32 %v585_v51, %v496_v49  ;;  %v1198_v54 = vpop.f32.mrb[1].mxu1 }
 0x150   : > { %v499_v55 = vpop.f32.mrb[2].mxu0  ;;  %v588_v56 = vpop.f32.mrb[2].mxu1 }
 0x151   : > { %v1179_v57 = vpop.f32.mrb[3].mxu0  ;;  %v598_v58 = vadd.f32 %v1088_v50, %v586_v53  ;;  %v589_v59 = vadd.f32 %v588_v56, %v499_v55  ;;  %v1199_v60 = vpop.f32.mrb[3].mxu1 }
 0x153   : > { %814 = vst [vmem:[%s1868_s18] sm:$0xff] %v598_v58  ;;  %v599_v61 = vadd.f32 %v1088_v50, %v589_v59 }
 0x155   : > { %815 = vst [vmem:[%s1868_s18 + $0x8] sm:$0xff] %v599_v61 }
 0x16e   : > { %v716_v62 = vpop.f32.mrb[4].mxu0  ;;  %v805_v63 = vpop.f32.mrb[4].mxu1 }
 0x16f   : > { %v1218_v0 = vpop.f32.mrb[5].mxu0  ;;  %v806_v1 = vadd.f32 %v805_v63, %v716_v62  ;;  %v1238_v2 = vpop.f32.mrb[5].mxu1  ;;  %821 = sbr.rel (%p2041_p4) target bundleno = 374 (0x176), region = 52 }
 0x170   : > { %v719_v3 = vpop.f32.mrb[6].mxu0  ;;  %v808_v4 = vpop.f32.mrb[6].mxu1 }
 0x171   : > { %v1219_v5 = vpop.f32.mrb[7].mxu0  ;;  %v812_v6 = vadd.f32 %v1088_v50, %v806_v1  ;;  %v809_v7 = vadd.f32 %v808_v4, %v719_v3  ;;  %v1239_v8 = vpop.f32.mrb[7].mxu1 }
 0x173   : > { %816 = vst [vmem:[%s340_s16] sm:$0xff] %v812_v6  ;;  %v813_v9 = vadd.f32 %v1088_v50, %v809_v7 }
 0x175   : > { %817 = vst [vmem:[%s340_s16 + $0x8] sm:$0xff] %v813_v9 }
 0x176 PF: > { %v825_v11 = vadd.f32 %v599_v61, %v598_v58  ;;  %v832_v12 = vadd.f32 %v813_v9, %v812_v6  ;;  %v843_v13 = vmul.f32 %v598_v58, %v598_v58  ;;  %v844_v14 = vmul.f32 %v599_v61, %v599_v61  ;;  %s869_s17 = sand.u32 1, %s1662_s29   ;;  %s1122_s1 = sshll.u32 %s1662_s29, 8 }
 0x177   : > { %v852_v15 = vmul.f32 %v812_v6, %v812_v6  ;;  %v853_v16 = vmul.f32 %v813_v9, %v813_v9  ;;  %s1880_s12 = scalar_lea.hbm %s2024_s6, %s1122_s1  ;;  %s899_s24 = sshll.u32 %s340_s16, 4  ;;  %s1882_s24 = int_to_ptr.vmem [resolvable:$true] %s899_s24 }
 0x178   : > { %v826_v17 = vrot.slane %v825_v11, 4  ;;  %v833_v18 = vrot.slane %v832_v12, 4  ;;  %v845_v19 = vadd.f32 %v844_v14, %v843_v13  ;;  %s1887_s13 = scalar_lea.hbm %s2023_s5, %s1122_s1  ;;  %s1889_s9 = scalar_lea.sflag [#allocation9], %s869_s17 }
 0x179   : > { %v854_v20 = vadd.f32 %v853_v16, %v852_v15  ;;  %s1416_s11 = scalar_lea.vmem %s1882_s24, 256  ;;  %s1590_s16 = smov [#allocation8]  }
 0x17a   : > { %v827_v21 = vadd.f32 %v826_v17, %v825_v11  ;;  %v834_v22 = vadd.f32 %v833_v18, %v832_v12  ;;  %v846_v23 = vrot.slane %v845_v19, 4  ;;  %p1417_p6 = scmp.ne.s32.totalorder %s1882_s24, %s1416_s11  ;;  %s1420_s19 = sshll.u32 %s1590_s16, 4  ;;  %s1421_s19 = int_to_ptr.vmem [resolvable:$false] %s1420_s19 }
 0x17b   : > { %v855_v24 = vrot.slane %v854_v20, 4  ;;  %s1422_s23 = scalar_lea.vmem %s1421_s19, 512  ;;  %p1423_p13 = scmp.lt.s32.totalorder %s1882_s24, %s1421_s19 }
 0x17c   : > { %p1418_p8 = pnand %p1417_p6, %p1735_p11  ;;  %p1424_p3 = scmp.lt.s32.totalorder %s1422_s23, %s1416_s11 }
 0x17e   : > { %p1419_p9 = pneg %p1418_p8  ;;  %p1425_p7 = por %p1424_p3, %p1423_p13 }
 0x180   : > { %p1426_p10 = pnand %p1425_p7, %p1419_p9 }
 0x182   : > { %1429 = shalt.err (!%p1426_p10)
}
 0x183   : > { %s1430_s17 = scalar_lea.hbm %s1880_s12, 256  ;;  %s1434_s22 = scalar_lea.hbm %s2024_s6, 512 }
 0x184   : > { %p1431_p2 = scmp.ne.s32.totalorder %s1880_s12, %s1430_s17  ;;  %p1435_p12 = scmp.lt.u32.totalorder %s1880_s12, %s2024_s6 }
 0x185   : > { %p1436_p1 = scmp.lt.u32.totalorder %s1434_s22, %s1430_s17  ;;  %p1438_p6 = scmp.lt.u32.totalorder %s1430_s17, %s1880_s12 }
 0x186   : > { %p1432_p0 = pnand %p1431_p2, %p1735_p11 }
 0x187   : > { %p1437_p4 = por %p1436_p1, %p1435_p12 }
 0x188   : > { %p1433_p5 = pneg %p1432_p0 }
 0x189   : > { %p1439_p8 = por %p1438_p6, %p1437_p4 }
 0x18b   : > { %p1440_p9 = pnand %p1439_p8, %p1433_p5 }
 0x18d   : > { %1443 = shalt.err (!%p1440_p9)
}
 0x18e   : > { %s1591_s11 = smov 128   ;;  %s1592_s23 = smov 8   ;;  %v828_v25 = vrot.slane %v827_v21, 2  ;;  %v835_v26 = vrot.slane %v834_v22, 2  ;;  %v847_v27 = vadd.f32 %v846_v23, %v845_v19  ;;  %v856_v28 = vadd.f32 %v855_v24, %v854_v20 }
 0x18f   : > { %1247 = dma.vmem_to_hbm [thread:$0]  (%p1735_p11), %s1882_s24, 256, %s1880_s12, %s1889_s9, %s1591_s11, %s1591_s11, %s1592_s23  }
 0x190   : > { %s883_s17 = sshll.u32 %s1868_s18, 4  ;;  %v829_v29 = vadd.f32 %v828_v25, %v827_v21  ;;  %v836_v30 = vadd.f32 %v835_v26, %v834_v22  ;;  %v848_v31 = vrot.slane %v847_v27, 2  ;;  %s865_s1 = scalar_lea.sflag [#allocation4], %s1783_s14  ;;  %s1917_s17 = int_to_ptr.vmem [resolvable:$true] %s883_s17 }
 0x191   : > { %s1444_s25 = scalar_lea.vmem %s1917_s17, 256  ;;  %s1593_s12 = smov [#allocation7]  }
 0x192   : > { %p1445_p13 = scmp.ne.s32.totalorder %s1917_s17, %s1444_s25  ;;  %s1448_s24 = sshll.u32 %s1593_s12, 4  ;;  %s1449_s24 = int_to_ptr.vmem [resolvable:$false] %s1448_s24 }
 0x193   : > { %s1450_s9 = scalar_lea.vmem %s1449_s24, 512  ;;  %p1451_p10 = scmp.lt.s32.totalorder %s1917_s17, %s1449_s24 }
 0x194   : > { %p1446_p3 = pnand %p1445_p13, %p1735_p11  ;;  %p1452_p2 = scmp.lt.s32.totalorder %s1450_s9, %s1444_s25 }
 0x196   : > { %p1447_p7 = pneg %p1446_p3  ;;  %p1453_p0 = por %p1452_p2, %p1451_p10 }
 0x198   : > { %p1454_p5 = pnand %p1453_p0, %p1447_p7 }
 0x19a   : > { %1457 = shalt.err (!%p1454_p5)
}
 0x19b   : > { %s1458_s18 = scalar_lea.hbm %s1887_s13, 256  ;;  %s1462_s19 = scalar_lea.hbm %s2023_s5, 512 }
 0x19c   : > { %p1459_p12 = scmp.ne.s32.totalorder %s1887_s13, %s1458_s18  ;;  %p1463_p6 = scmp.lt.u32.totalorder %s1887_s13, %s2023_s5 }
 0x19d   : > { %p1464_p8 = scmp.lt.u32.totalorder %s1462_s19, %s1458_s18  ;;  %p1466_p13 = scmp.lt.u32.totalorder %s1458_s18, %s1887_s13 }
 0x19e   : > { %p1460_p1 = pnand %p1459_p12, %p1735_p11 }
 0x19f   : > { %p1465_p9 = por %p1464_p8, %p1463_p6 }
 0x1a0   : > { %p1461_p4 = pneg %p1460_p1 }
 0x1a1   : > { %p1467_p3 = por %p1466_p13, %p1465_p9 }
 0x1a3   : > { %p1468_p7 = pnand %p1467_p3, %p1461_p4 }
 0x1a5   : > { %1471 = shalt.err (!%p1468_p7)
}
 0x1a6   : > { %1246 = dma.vmem_to_hbm [thread:$0]  (%p1735_p11), %s1917_s17, 256, %s1887_s13, %s865_s1, %s1591_s11, %s1591_s11, %s1592_s23   ;;  %v857_v32 = vrot.slane %v856_v28, 2  ;;  %v830_v33 = vrot.slane %v829_v29, 1  ;;  %v837_v34 = vrot.slane %v836_v30, 1  ;;  %v849_v35 = vadd.f32 %v848_v31, %v847_v27  ;;  %v824_v40 = vld [vmem:[#allocation10] sm:$0x1] }
 0x1a7   : > { %s1594_s25 = smov [#allocation10]   ;;  %s1595_s14 = smov [#allocation11]   ;;  %v842_v46 = vld [vmem:[#allocation11] sm:$0x1] }
 0x1a8   : > { %v858_v36 = vadd.f32 %v857_v32, %v856_v28  ;;  %v831_v37 = vadd.f32 %v830_v33, %v829_v29  ;;  %v838_v38 = vadd.f32 %v837_v34, %v836_v30  ;;  %v850_v39 = vrot.slane %v849_v35, 1  ;;  %s913_s21 = sshll.u32 %s1594_s25, 4  ;;  %s924_s9 = sshll.u32 %s1595_s14, 4  ;;  %s914_s21 = int_to_ptr.vmem [resolvable:$true] %s913_s21  ;;  %s1946_s9 = int_to_ptr.vmem [resolvable:$true] %s924_s9 }
 0x1a9   : > { %s1472_s13 = scalar_lea.vmem %s914_s21, 16  ;;  %p2042_p10 = scmp.eq.s32.totalorder %s1662_s29, 1 }
 0x1aa   : > { %v859_v41 = vrot.slane %v858_v36, 1  ;;  %v839_v42 = vadd.f32 %v838_v38, %v831_v37  ;;  %v851_v43 = vadd.f32 %v850_v39, %v849_v35  ;;  %p1473_p11 = scmp.ne.s32.totalorder %s914_s21, %s1472_s13  ;;  %s1478_s11 = scalar_lea.vmem %s914_s21, 32 }
 0x1ab   : > { %p1479_p5 = scmp.lt.s32.totalorder %s914_s21, %s914_s21  ;;  %p1480_p12 = scmp.lt.s32.totalorder %s1478_s11, %s1472_s13 }
 0x1ac   : > { %v860_v44 = vadd.f32 %v859_v41, %v858_v36  ;;  %v840_v45 = vadd.f32 %v839_v42, %v824_v40  ;;  %p1474_p2 = pnand %p1473_p11, %p2042_p10 }
 0x1ad   : > { %p1481_p1 = por %p1480_p12, %p1479_p5 }
 0x1ae   : > { %v861_v47 = vadd.f32 %v860_v44, %v851_v43  ;;  %841 = vst [vmem:[#allocation10] sm:$0x1] %v840_v45  ;;  %p1475_p0 = pneg %p1474_p2 }
 0x1b0   : > { %v862_v48 = vadd.f32 %v861_v47, %v842_v46  ;;  %p1482_p4 = pnand %p1481_p1, %p1475_p0 }
 0x1b2   : > { %1485 = shalt.err (!%p1482_p4)
}
 0x1b3   : > { %s1486_s1 = scalar_lea.hbm %s2025_s7, 16  ;;  %p2043_p8 = pmov %p2042_p10 }
 0x1b4   : > { %p1487_p6 = scmp.ne.s32.totalorder %s2025_s7, %s1486_s1  ;;  %p1492_p3 = scmp.lt.u32.totalorder %s1486_s1, %s2025_s7 }
 0x1b6   : > { %p1488_p9 = pnand %p1487_p6, %p2043_p8 }
 0x1b8   : > { %p1489_p13 = pneg %p1488_p9 }
 0x1ba   : > { %p1494_p7 = pnand %p1492_p3, %p1489_p13 }
 0x1bc   : > { %1497 = shalt.err (!%p1494_p7)
}
 0x1bd   : > { %p2044_p11 = pmov %p2043_p8  ;;  %863 = vst [vmem:[#allocation11] sm:$0x1] %v862_v48  ;;  %s1498_s25 = scalar_lea.vmem %s1946_s9, 16 }
 0x1be   : > { %p1499_p10 = scmp.ne.s32.totalorder %s1946_s9, %s1498_s25  ;;  %p2045_p2 = pmov %p2043_p8 }
 0x1bf   : > { %1249 = dma.vmem_to_hbm [thread:$0]  (%p2044_p11), %s914_s21, 16, %s2025_s7, [#allocation9]  }
 0x1c0   : > { %p1500_p0 = pnand %p1499_p10, %p2045_p2  ;;  %s1504_s14 = scalar_lea.vmem %s1946_s9, 32 }
 0x1c1   : > { %p1505_p12 = scmp.lt.s32.totalorder %s1946_s9, %s1946_s9  ;;  %p1506_p1 = scmp.lt.s32.totalorder %s1504_s14, %s1498_s25 }
 0x1c2   : > { %p1501_p5 = pneg %p1500_p0 }
 0x1c3   : > { %p1507_p4 = por %p1506_p1, %p1505_p12 }
 0x1c5   : > { %p1508_p6 = pnand %p1507_p4, %p1501_p5 }
 0x1c7   : > { %1511 = shalt.err (!%p1508_p6)
}
 0x1c8   : > { %s1512_s23 = scalar_lea.hbm %s2026_s8, 16  ;;  %p2046_p9 = pmov %p2045_p2 }
 0x1c9   : > { %p1513_p8 = scmp.ne.s32.totalorder %s2026_s8, %s1512_s23  ;;  %p1518_p7 = scmp.lt.u32.totalorder %s1512_s23, %s2026_s8 }
 0x1cb   : > { %p1514_p13 = pnand %p1513_p8, %p2046_p9 }
 0x1cd   : > { %p1515_p3 = pneg %p1514_p13 }
 0x1cf   : > { %p1520_p11 = pnand %p1518_p7, %p1515_p3 }
 0x1d1   : > { %1523 = shalt.err (!%p1520_p11)
}
 0x1d2   : > { %p2047_p10 = pmov %p2045_p2 }
 0x1d4   : > { %1251 = dma.vmem_to_hbm [thread:$0]  (%p2047_p10), %s1946_s9, 16, %s2026_s8, [#allocation12]  }
 0x1d5   : > { %1549 = dma.done.wait (%p2045_p2), [#allocation9], 16   ;;  %p2048_p0 = pmov %p2045_p2 }
 0x1d7   : > { %1551 = vsyncadd (%p2048_p0), [#allocation9], 4294967280  ;;  %p2049_p5 = pmov %p2048_p0 }
 0x1d8   : > { %p2050_p12 = pmov %p2048_p0 }
 0x1d9   : > { %1553 = dma.done.wait (%p2049_p5), [#allocation12], 16  }
 0x1da   : > { %1555 = vsyncadd (%p2050_p12), [#allocation12], 4294967280 }
 0x1db PF: > { %s944_s19 = sand.u32 1, %s1566_s2   ;;  %p2051_p1 = scmp.ne.s32.totalorder %s2031_s10, 0 }
 0x1dc   : > { %p2052_p4 = scmp.ge.s32.totalorder %s1578_s28, 2  ;;  %s945_s9 = scalar_lea.sflag [#allocation4], %s944_s19 }
 0x1de   : > { %p1267_p6 = pnand %p2052_p4, %p2051_p1 }
 0x1e0   : > { %1557 = dma.done.wait (!%p1267_p6), %s945_s9, 256  }
 0x1e1   : > { %1559 = vsyncadd (!%p1267_p6), %s945_s9, 4294967040  ;;  %s953_s12 = sand.u32 1, %s1057_s30  }
 0x1e2   : > { %s954_s24 = scalar_lea.sflag [#allocation9], %s953_s12 }
 0x1e3   : > { %1561 = dma.done.wait (!%p1267_p6), %s954_s24, 256  }
 0x1e4   : > { %1563 = vsyncadd (!%p1267_p6), %s954_s24, 4294967040  ;;  %p27_p8 = scmp.ge.s32.totalorder %s1700_s15, 4   ;;  %s2053_s2 = smov %s1570_s26 }
 0x1e5   : > { %s2054_s26 = smov %s1574_s27  ;;  %s2055_s27 = smov %s1731_s20 }
 0x1e6   : > { %s2056_s28 = smov %s1700_s15  ;;  %29 = sbr.rel (!%p27_p8) target bundleno = 9 (0x9), region = 129 }
 0x1ed   :  { %959 = vsyncpa [#allocation3], 1 }
 0x1ee   :  { %961 = vsyncpa [#allocation3 + $0x1], 1 }
 0x1ef   :  { %962 = vsyncpa [#allocation6], 1 }
 0x1f0   :  { %963 = vsyncpa [#allocation4], 1 }
 0x1f1   :  { %965 = vsyncpa [#allocation4 + $0x1], 1 }
 0x1f2   :  { %966 = vsyncpa [#allocation9], 1 }
 0x1f3   :  { %968 = vsyncpa [#allocation9 + $0x1], 1 }
 0x1f4   :  { %969 = vsyncpa [#allocation12], 1 }

</bundles_post_ra>
